<compile_context>
chip_gen: v6e
topology: v6e:2x2x1
jax: 0.10.0
libtpu: 0.0.40
codegen_flags: <defaults>
</compile_context>

<pallas_src>
import math
import functools

import jax
import jax.numpy as jnp
from jax.experimental import pallas as pl
from jax.experimental.pallas import tpu as pltpu

NUM_LAYERS = 8
LRELU_SLOPE = 0.2
PIXELNORM_EPS = 1e-8


def _round_up(n, m):
    return ((n + m - 1) // m) * m


def _choose_tile_m(batch):
    """Batch tile: multiple of 8, <=512 rows, >=2 grid steps when batch > 8,
    preferring a tile that divides the sublane-rounded batch (no padding)."""
    b8 = _round_up(batch, 8)
    if b8 <= 8:
        return 8
    max_tile = max(8, min(512, (b8 // 2) // 8 * 8))   # guarantees >= 2 steps
    for t in range(max_tile, 7, -8):
        if b8 % t == 0:
            return t
    return max_tile


def mapping_network_kernel(x_ref, w_ref, b_ref, o_ref):
    """One batch tile of the MappingNetwork forward.

    x_ref : VMEM f32[TILE_M, D]   latent codes (batch tile)
    w_ref : VMEM bf16[8, D, D]    stacked, pre-scaled weights (in, out), resident
    b_ref : VMEM f32[8, D]        stacked biases, resident
    o_ref : VMEM f32[TILE_M, D]   style vectors (batch tile)
    """
    x = x_ref[...].astype(jnp.float32)

    # --- PixelNorm over the feature axis (dim=1), in f32 ---
    mean_sq = jnp.mean(x * x, axis=1, keepdims=True)
    x = x * jax.lax.rsqrt(mean_sq + PIXELNORM_EPS)

    b_all = b_ref[...]  # (8, D) f32, loaded once

    # --- 8 x (ScaledLinear + LeakyReLU(0.2)), static unroll ---
    # Equalized-LR scale already folded into the bf16 weights in the wrapper.
    for layer in range(NUM_LAYERS):
        y = jnp.dot(x.astype(w_ref.dtype), w_ref[layer],
                    preferred_element_type=jnp.float32)   # MXU, f32 accumulate
        y = y + b_all[layer]                               # bias broadcast, f32
        x = jnp.maximum(y, LRELU_SLOPE * y)                # LeakyReLU(0.2), f32

    o_ref[...] = x.astype(o_ref.dtype)


@functools.partial(jax.jit, static_argnames=("scales", "tile_m"))
def mapping_network_forward(x, weights, biases, scales, tile_m=None):
    """x: f32[B, D]; weights: f32[8, D, D]; biases: f32[8, D];
    scales: static tuple of 8 floats (sqrt(2/fan_in))."""
    B, D = x.shape
    assert weights.shape == (NUM_LAYERS, D, D)
    assert biases.shape == (NUM_LAYERS, D)
    assert len(scales) == NUM_LAYERS

    if tile_m is None:
        tile_m = _choose_tile_m(B)
    Bp = _round_up(B, tile_m)
    x_p = jnp.pad(x, ((0, Bp - B), (0, 0))) if Bp != B else x

    # Fold the equalized-LR scale into the f32 weights, then cast once to bf16:
    # module semantics (scale on W), half the weight DMA bytes, 2x MXU rate.
    scale_vec = jnp.asarray(scales, dtype=weights.dtype)[:, None, None]
    w_bf16 = (weights * scale_vec).astype(jnp.bfloat16)
    b_f32 = biases.astype(jnp.float32)

    grid = (Bp // tile_m,)

    # Resident VMEM: x/out tiles double-buffered; weights/biases single-buffered
    # (pl.Buffered(1) + constant index_map).  Only raise the scoped-VMEM limit
    # when needed, and cap it generation-aware (never the whole VMEM on v7x).
    resident = (2 * 2 * tile_m * D * 4        # x + out tiles, f32, 2-buffered
                + NUM_LAYERS * D * D * 2      # bf16 weights, single buffer
                + NUM_LAYERS * D * 4)         # biases, single buffer
    needed = resident + (4 << 20)             # headroom for unrolled temps
    if needed <= (16 << 20):
        vmem_limit = None                     # leave compiler default alone
    else:
        try:
            cap = int(pltpu.get_tpu_info().vmem_capacity_bytes) * 3 // 4
        except Exception:
            cap = 48 << 20                    # safe even on v7x (64 MiB/TC)
        vmem_limit = min(needed, cap)

    flops = 2 * NUM_LAYERS * Bp * D * D
    bytes_accessed = 2 * Bp * D * 4 + w_bf16.size * 2 + b_f32.size * 4

    out = pl.pallas_call(
        mapping_network_kernel,
        out_shape=jax.ShapeDtypeStruct((Bp, D), x.dtype),
        grid_spec=pltpu.PrefetchScalarGridSpec(
            num_scalar_prefetch=0,
            grid=grid,
            in_specs=[
                pl.BlockSpec((tile_m, D), lambda i: (i, 0)),              # x tile
                pl.BlockSpec((NUM_LAYERS, D, D), lambda i: (0, 0, 0),
                             pipeline_mode=pl.Buffered(1)),               # W resident
                pl.BlockSpec((NUM_LAYERS, D), lambda i: (0, 0),
                             pipeline_mode=pl.Buffered(1)),               # b resident
            ],
            out_specs=pl.BlockSpec((tile_m, D), lambda i: (i, 0)),
        ),
        compiler_params=pltpu.CompilerParams(
            dimension_semantics=("parallel",),
            vmem_limit_bytes=vmem_limit,
        ),
        cost_estimate=pl.CostEstimate(
            flops=flops, transcendentals=Bp, bytes_accessed=bytes_accessed),
    )(x_p, w_bf16, b_f32)

    return out[:B] if Bp != B else out


def init_params(key, latent_dim, style_dim):
    """Deterministic synthetic init mirroring the module's __init__ shapes.

    Layer i==1: (latent_dim -> style_dim); all others: (style_dim -> style_dim).
    Weights ~ N(0,1) (equalized-LR convention), biases zero, scale = sqrt(2/fan_in).
    """
    assert latent_dim == style_dim, "original module only composes when equal"
    D = style_dim
    keys = jax.random.split(key, NUM_LAYERS)
    weights = jnp.stack(
        [jax.random.normal(keys[i], (D, D), dtype=jnp.float32)
         for i in range(NUM_LAYERS)]
    )
    biases = jnp.zeros((NUM_LAYERS, D), dtype=jnp.float32)
    fan_in = [latent_dim if i == 1 else style_dim for i in range(NUM_LAYERS)]
    scales = tuple(math.sqrt(2.0 / f) for f in fan_in)  # static Python floats
    return weights, biases, scales


def reference_forward_f32(x, weights, biases, scales):
    """Pure-JAX f32 reference (module semantics)."""
    x = x * jax.lax.rsqrt(jnp.mean(x * x, axis=1, keepdims=True) + PIXELNORM_EPS)
    for i in range(NUM_LAYERS):
        y = x @ (weights[i] * scales[i]) + biases[i]
        x = jnp.maximum(y, LRELU_SLOPE * y)
    return x


def reference_forward_bf16(x, weights, biases, scales):
    """Pure-JAX reference mirroring the kernel's numerics exactly:
    scale folded into f32 W, bf16 matmul operands, f32 accumulate/elementwise."""
    x = x * jax.lax.rsqrt(jnp.mean(x * x, axis=1, keepdims=True) + PIXELNORM_EPS)
    w_bf16 = (weights
              * jnp.asarray(scales, dtype=weights.dtype)[:, None, None]
              ).astype(jnp.bfloat16)
    for i in range(NUM_LAYERS):
        y = jnp.dot(x.astype(jnp.bfloat16), w_bf16[i],
                    preferred_element_type=jnp.float32) + biases[i]
        x = jnp.maximum(y, LRELU_SLOPE * y)
    return x


if __name__ == "__main__":
    latent_dim = style_dim = 128
    batch = 36  # non-multiple of 8 -> exercises padding + a multi-step grid

    key = jax.random.PRNGKey(0)
    k_x, k_p = jax.random.split(key)
    x = jax.random.normal(k_x, (batch, latent_dim), dtype=jnp.float32)
    weights, biases, scales = init_params(k_p, latent_dim, style_dim)

    out = mapping_network_forward(x, weights, biases, scales)
    out = jax.block_until_ready(out)
    assert out.shape == (batch, style_dim)

    # Tight check vs. a reference with identical bf16-matmul numerics.
    ref_bf16 = reference_forward_bf16(x, weights, biases, scales)
    assert jnp.allclose(out, ref_bf16, atol=1e-3, rtol=1e-3), "mismatch vs bf16 reference"

    # Loose check vs. the pure-f32 module semantics (bf16 weight rounding only).
    ref_f32 = reference_forward_f32(x, weights, biases, scales)
    assert jnp.allclose(out, ref_f32, atol=1e-1, rtol=1e-1), "mismatch vs f32 reference"

    print("KERNEL_OK")
</pallas_src>

<mosaic_0001>
module attributes {stable_mosaic.version = 11 : i64} {
  func.func @mapping_network_kernel(%arg0: i32, %arg1: memref<8x128xf32, #tpu.memory_space<vmem>>, %arg2: memref<8x128x128xbf16, #tpu.memory_space<vmem>>, %arg3: memref<8x128xf32, #tpu.memory_space<vmem>>, %arg4: memref<8x128xf32, #tpu.memory_space<vmem>>) attributes {dimension_semantics = [#tpu.dimension_semantics<parallel>], iteration_bounds = array<i64: 5>, scalar_prefetch = 0 : i64, scratch_operands = 0 : i64, tpu.core_type = #tpu.core_type<tc>, window_params = [{transform_indices = @transform_0, window_bounds = array<i64: 8, 128>}, {pipeline_mode = #tpu.pipeline_mode<synchronous>, transform_indices = @transform_1, window_bounds = array<i64: 8, 128, 128>}, {pipeline_mode = #tpu.pipeline_mode<synchronous>, transform_indices = @transform_2, window_bounds = array<i64: 8, 128>}, {transform_indices = @transform_3, window_bounds = array<i64: 8, 128>}]} {
    %c0 = arith.constant 0 : index
    %c0_0 = arith.constant 0 : index
    %0 = vector.load %arg1[%c0, %c0_0] : memref<8x128xf32, #tpu.memory_space<vmem>>, vector<8x128xf32>
    %1 = arith.mulf %0, %0 : vector<8x128xf32>
    %cst = arith.constant dense<0.000000e+00> : vector<8xf32>
    %2 = vector.multi_reduction <add>, %1, %cst [1] : vector<8x128xf32> to vector<8xf32>
    %3 = vector.shape_cast %2 : vector<8xf32> to vector<8x1xf32>
    %cst_1 = arith.constant 1.280000e+02 : f32
    %4 = vector.broadcast %cst_1 : f32 to vector<8x1xf32>
    %5 = arith.divf %3, %4 : vector<8x1xf32>
    %cst_2 = arith.constant 9.99999993E-9 : f32
    %6 = vector.broadcast %cst_2 : f32 to vector<8x1xf32>
    %7 = arith.addf %5, %6 : vector<8x1xf32>
    %8 = math.rsqrt %7 : vector<8x1xf32>
    %9 = vector.broadcast %8 : vector<8x1xf32> to vector<8x128xf32>
    %10 = arith.mulf %0, %9 : vector<8x128xf32>
    %c0_3 = arith.constant 0 : index
    %c0_4 = arith.constant 0 : index
    %11 = vector.load %arg3[%c0_3, %c0_4] : memref<8x128xf32, #tpu.memory_space<vmem>>, vector<8x128xf32>
    %12 = arith.truncf %10 : vector<8x128xf32> to vector<8x128xbf16>
    %c0_5 = arith.constant 0 : index
    %c0_6 = arith.constant 0 : index
    %c0_7 = arith.constant 0 : index
    %13 = vector.load %arg2[%c0_5, %c0_6, %c0_7] : memref<8x128x128xbf16, #tpu.memory_space<vmem>>, vector<1x128x128xbf16>
    %14 = vector.shape_cast %13 : vector<1x128x128xbf16> to vector<128x128xbf16>
    %cst_8 = arith.constant dense<0.000000e+00> : vector<8x128xf32>
    %15 = tpu.matmul %12, %14, %cst_8 {dimension_numbers = #tpu.dot_dimension_numbers<[1], [0], [0], [1], [0, 0, 1, 1], [], []>} : vector<8x128xbf16>, vector<128x128xbf16>, vector<8x128xf32> -> vector<8x128xf32>
    %16 = vector.extract_strided_slice %11 {offsets = [0, 0], sizes = [1, 128], strides = [1, 1]} : vector<8x128xf32> to vector<1x128xf32>
    %17 = vector.shape_cast %16 : vector<1x128xf32> to vector<128xf32>
    %18 = vector.shape_cast %17 : vector<128xf32> to vector<1x128xf32>
    %19 = vector.broadcast %18 : vector<1x128xf32> to vector<8x128xf32>
    %20 = arith.addf %15, %19 : vector<8x128xf32>
    %cst_9 = arith.constant 2.000000e-01 : f32
    %21 = vector.broadcast %cst_9 : f32 to vector<8x128xf32>
    %22 = arith.mulf %21, %20 : vector<8x128xf32>
    %23 = arith.maximumf %20, %22 : vector<8x128xf32>
    %24 = arith.truncf %23 : vector<8x128xf32> to vector<8x128xbf16>
    %c1 = arith.constant 1 : index
    %c0_10 = arith.constant 0 : index
    %c0_11 = arith.constant 0 : index
    %25 = vector.load %arg2[%c1, %c0_10, %c0_11] : memref<8x128x128xbf16, #tpu.memory_space<vmem>>, vector<1x128x128xbf16>
    %26 = vector.shape_cast %25 : vector<1x128x128xbf16> to vector<128x128xbf16>
    %cst_12 = arith.constant dense<0.000000e+00> : vector<8x128xf32>
    %27 = tpu.matmul %24, %26, %cst_12 {dimension_numbers = #tpu.dot_dimension_numbers<[1], [0], [0], [1], [0, 0, 1, 1], [], []>} : vector<8x128xbf16>, vector<128x128xbf16>, vector<8x128xf32> -> vector<8x128xf32>
    %28 = vector.extract_strided_slice %11 {offsets = [1, 0], sizes = [1, 128], strides = [1, 1]} : vector<8x128xf32> to vector<1x128xf32>
    %29 = vector.shape_cast %28 : vector<1x128xf32> to vector<128xf32>
    %30 = vector.shape_cast %29 : vector<128xf32> to vector<1x128xf32>
    %31 = vector.broadcast %30 : vector<1x128xf32> to vector<8x128xf32>
    %32 = arith.addf %27, %31 : vector<8x128xf32>
    %cst_13 = arith.constant 2.000000e-01 : f32
    %33 = vector.broadcast %cst_13 : f32 to vector<8x128xf32>
    %34 = arith.mulf %33, %32 : vector<8x128xf32>
    %35 = arith.maximumf %32, %34 : vector<8x128xf32>
    %36 = arith.truncf %35 : vector<8x128xf32> to vector<8x128xbf16>
    %c2 = arith.constant 2 : index
    %c0_14 = arith.constant 0 : index
    %c0_15 = arith.constant 0 : index
    %37 = vector.load %arg2[%c2, %c0_14, %c0_15] : memref<8x128x128xbf16, #tpu.memory_space<vmem>>, vector<1x128x128xbf16>
    %38 = vector.shape_cast %37 : vector<1x128x128xbf16> to vector<128x128xbf16>
    %cst_16 = arith.constant dense<0.000000e+00> : vector<8x128xf32>
    %39 = tpu.matmul %36, %38, %cst_16 {dimension_numbers = #tpu.dot_dimension_numbers<[1], [0], [0], [1], [0, 0, 1, 1], [], []>} : vector<8x128xbf16>, vector<128x128xbf16>, vector<8x128xf32> -> vector<8x128xf32>
    %40 = vector.extract_strided_slice %11 {offsets = [2, 0], sizes = [1, 128], strides = [1, 1]} : vector<8x128xf32> to vector<1x128xf32>
    %41 = vector.shape_cast %40 : vector<1x128xf32> to vector<128xf32>
    %42 = vector.shape_cast %41 : vector<128xf32> to vector<1x128xf32>
    %43 = vector.broadcast %42 : vector<1x128xf32> to vector<8x128xf32>
    %44 = arith.addf %39, %43 : vector<8x128xf32>
    %cst_17 = arith.constant 2.000000e-01 : f32
    %45 = vector.broadcast %cst_17 : f32 to vector<8x128xf32>
    %46 = arith.mulf %45, %44 : vector<8x128xf32>
    %47 = arith.maximumf %44, %46 : vector<8x128xf32>
    %48 = arith.truncf %47 : vector<8x128xf32> to vector<8x128xbf16>
    %c3 = arith.constant 3 : index
    %c0_18 = arith.constant 0 : index
    %c0_19 = arith.constant 0 : index
    %49 = vector.load %arg2[%c3, %c0_18, %c0_19] : memref<8x128x128xbf16, #tpu.memory_space<vmem>>, vector<1x128x128xbf16>
    %50 = vector.shape_cast %49 : vector<1x128x128xbf16> to vector<128x128xbf16>
    %cst_20 = arith.constant dense<0.000000e+00> : vector<8x128xf32>
    %51 = tpu.matmul %48, %50, %cst_20 {dimension_numbers = #tpu.dot_dimension_numbers<[1], [0], [0], [1], [0, 0, 1, 1], [], []>} : vector<8x128xbf16>, vector<128x128xbf16>, vector<8x128xf32> -> vector<8x128xf32>
    %52 = vector.extract_strided_slice %11 {offsets = [3, 0], sizes = [1, 128], strides = [1, 1]} : vector<8x128xf32> to vector<1x128xf32>
    %53 = vector.shape_cast %52 : vector<1x128xf32> to vector<128xf32>
    %54 = vector.shape_cast %53 : vector<128xf32> to vector<1x128xf32>
    %55 = vector.broadcast %54 : vector<1x128xf32> to vector<8x128xf32>
    %56 = arith.addf %51, %55 : vector<8x128xf32>
    %cst_21 = arith.constant 2.000000e-01 : f32
    %57 = vector.broadcast %cst_21 : f32 to vector<8x128xf32>
    %58 = arith.mulf %57, %56 : vector<8x128xf32>
    %59 = arith.maximumf %56, %58 : vector<8x128xf32>
    %60 = arith.truncf %59 : vector<8x128xf32> to vector<8x128xbf16>
    %c4 = arith.constant 4 : index
    %c0_22 = arith.constant 0 : index
    %c0_23 = arith.constant 0 : index
    %61 = vector.load %arg2[%c4, %c0_22, %c0_23] : memref<8x128x128xbf16, #tpu.memory_space<vmem>>, vector<1x128x128xbf16>
    %62 = vector.shape_cast %61 : vector<1x128x128xbf16> to vector<128x128xbf16>
    %cst_24 = arith.constant dense<0.000000e+00> : vector<8x128xf32>
    %63 = tpu.matmul %60, %62, %cst_24 {dimension_numbers = #tpu.dot_dimension_numbers<[1], [0], [0], [1], [0, 0, 1, 1], [], []>} : vector<8x128xbf16>, vector<128x128xbf16>, vector<8x128xf32> -> vector<8x128xf32>
    %64 = vector.extract_strided_slice %11 {offsets = [4, 0], sizes = [1, 128], strides = [1, 1]} : vector<8x128xf32> to vector<1x128xf32>
    %65 = vector.shape_cast %64 : vector<1x128xf32> to vector<128xf32>
    %66 = vector.shape_cast %65 : vector<128xf32> to vector<1x128xf32>
    %67 = vector.broadcast %66 : vector<1x128xf32> to vector<8x128xf32>
    %68 = arith.addf %63, %67 : vector<8x128xf32>
    %cst_25 = arith.constant 2.000000e-01 : f32
    %69 = vector.broadcast %cst_25 : f32 to vector<8x128xf32>
    %70 = arith.mulf %69, %68 : vector<8x128xf32>
    %71 = arith.maximumf %68, %70 : vector<8x128xf32>
    %72 = arith.truncf %71 : vector<8x128xf32> to vector<8x128xbf16>
    %c5 = arith.constant 5 : index
    %c0_26 = arith.constant 0 : index
    %c0_27 = arith.constant 0 : index
    %73 = vector.load %arg2[%c5, %c0_26, %c0_27] : memref<8x128x128xbf16, #tpu.memory_space<vmem>>, vector<1x128x128xbf16>
    %74 = vector.shape_cast %73 : vector<1x128x128xbf16> to vector<128x128xbf16>
    %cst_28 = arith.constant dense<0.000000e+00> : vector<8x128xf32>
    %75 = tpu.matmul %72, %74, %cst_28 {dimension_numbers = #tpu.dot_dimension_numbers<[1], [0], [0], [1], [0, 0, 1, 1], [], []>} : vector<8x128xbf16>, vector<128x128xbf16>, vector<8x128xf32> -> vector<8x128xf32>
    %76 = vector.extract_strided_slice %11 {offsets = [5, 0], sizes = [1, 128], strides = [1, 1]} : vector<8x128xf32> to vector<1x128xf32>
    %77 = vector.shape_cast %76 : vector<1x128xf32> to vector<128xf32>
    %78 = vector.shape_cast %77 : vector<128xf32> to vector<1x128xf32>
    %79 = vector.broadcast %78 : vector<1x128xf32> to vector<8x128xf32>
    %80 = arith.addf %75, %79 : vector<8x128xf32>
    %cst_29 = arith.constant 2.000000e-01 : f32
    %81 = vector.broadcast %cst_29 : f32 to vector<8x128xf32>
    %82 = arith.mulf %81, %80 : vector<8x128xf32>
    %83 = arith.maximumf %80, %82 : vector<8x128xf32>
    %84 = arith.truncf %83 : vector<8x128xf32> to vector<8x128xbf16>
    %c6 = arith.constant 6 : index
    %c0_30 = arith.constant 0 : index
    %c0_31 = arith.constant 0 : index
    %85 = vector.load %arg2[%c6, %c0_30, %c0_31] : memref<8x128x128xbf16, #tpu.memory_space<vmem>>, vector<1x128x128xbf16>
    %86 = vector.shape_cast %85 : vector<1x128x128xbf16> to vector<128x128xbf16>
    %cst_32 = arith.constant dense<0.000000e+00> : vector<8x128xf32>
    %87 = tpu.matmul %84, %86, %cst_32 {dimension_numbers = #tpu.dot_dimension_numbers<[1], [0], [0], [1], [0, 0, 1, 1], [], []>} : vector<8x128xbf16>, vector<128x128xbf16>, vector<8x128xf32> -> vector<8x128xf32>
    %88 = vector.extract_strided_slice %11 {offsets = [6, 0], sizes = [1, 128], strides = [1, 1]} : vector<8x128xf32> to vector<1x128xf32>
    %89 = vector.shape_cast %88 : vector<1x128xf32> to vector<128xf32>
    %90 = vector.shape_cast %89 : vector<128xf32> to vector<1x128xf32>
    %91 = vector.broadcast %90 : vector<1x128xf32> to vector<8x128xf32>
    %92 = arith.addf %87, %91 : vector<8x128xf32>
    %cst_33 = arith.constant 2.000000e-01 : f32
    %93 = vector.broadcast %cst_33 : f32 to vector<8x128xf32>
    %94 = arith.mulf %93, %92 : vector<8x128xf32>
    %95 = arith.maximumf %92, %94 : vector<8x128xf32>
    %96 = arith.truncf %95 : vector<8x128xf32> to vector<8x128xbf16>
    %c7 = arith.constant 7 : index
    %c0_34 = arith.constant 0 : index
    %c0_35 = arith.constant 0 : index
    %97 = vector.load %arg2[%c7, %c0_34, %c0_35] : memref<8x128x128xbf16, #tpu.memory_space<vmem>>, vector<1x128x128xbf16>
    %98 = vector.shape_cast %97 : vector<1x128x128xbf16> to vector<128x128xbf16>
    %cst_36 = arith.constant dense<0.000000e+00> : vector<8x128xf32>
    %99 = tpu.matmul %96, %98, %cst_36 {dimension_numbers = #tpu.dot_dimension_numbers<[1], [0], [0], [1], [0, 0, 1, 1], [], []>} : vector<8x128xbf16>, vector<128x128xbf16>, vector<8x128xf32> -> vector<8x128xf32>
    %100 = vector.extract_strided_slice %11 {offsets = [7, 0], sizes = [1, 128], strides = [1, 1]} : vector<8x128xf32> to vector<1x128xf32>
    %101 = vector.shape_cast %100 : vector<1x128xf32> to vector<128xf32>
    %102 = vector.shape_cast %101 : vector<128xf32> to vector<1x128xf32>
    %103 = vector.broadcast %102 : vector<1x128xf32> to vector<8x128xf32>
    %104 = arith.addf %99, %103 : vector<8x128xf32>
    %cst_37 = arith.constant 2.000000e-01 : f32
    %105 = vector.broadcast %cst_37 : f32 to vector<8x128xf32>
    %106 = arith.mulf %105, %104 : vector<8x128xf32>
    %107 = arith.maximumf %104, %106 : vector<8x128xf32>
    %c0_38 = arith.constant 0 : index
    %c0_39 = arith.constant 0 : index
    %108 = vector.load %arg4[%c0_38, %c0_39] : memref<8x128xf32, #tpu.memory_space<vmem>>, vector<8x128xf32>
    tpu.vector_store %arg4[%c0_38, %c0_39], %107 {strides = array<i32>} : memref<8x128xf32, #tpu.memory_space<vmem>>, vector<8x128xf32>,
    return
  }
  func.func @transform_0(%arg0: i32) -> (i32, i32) {
    %c0_i32 = arith.constant 0 : i32
    %c0_i32_0 = arith.constant 0 : i32
    return %arg0, %c0_i32 : i32, i32
  }
  func.func @transform_1(%arg0: i32) -> (i32, i32, i32) {
    %c0_i32 = arith.constant 0 : i32
    %c0_i32_0 = arith.constant 0 : i32
    %c0_i32_1 = arith.constant 0 : i32
    %c0_i32_2 = arith.constant 0 : i32
    return %c0_i32, %c0_i32_0, %c0_i32_1 : i32, i32, i32
  }
  func.func @transform_2(%arg0: i32) -> (i32, i32) {
    %c0_i32 = arith.constant 0 : i32
    %c0_i32_0 = arith.constant 0 : i32
    %c0_i32_1 = arith.constant 0 : i32
    return %c0_i32, %c0_i32_0 : i32, i32
  }
  func.func @transform_3(%arg0: i32) -> (i32, i32) {
    %c0_i32 = arith.constant 0 : i32
    %c0_i32_0 = arith.constant 0 : i32
    return %arg0, %c0_i32 : i32, i32
  }
}

</mosaic_0001>

<bundles_post_ra>
// kernel: mapping_network_forward.1
= control target key start
LH: loop header
LB: loop body
LE: loop exit
PB: predicated region body
PF: predicated region fallthrough
CT: control target
= control target key end

     0   :  { %8 = vsyncpa [#allocation3], 0  ;;  %s2144_s0 = inlined_call_operand.vmem [shape: f32[40,128], index: 0, kind: input, shape index: {}]   ;;  %s2145_s1 = inlined_call_operand.vmem [shape: bf16[8,128,128], index: 1, kind: input, shape index: {}]   ;;  %s2146_s2 = inlined_call_operand.vmem [shape: f32[8,128], index: 2, kind: input, shape index: {}]   ;;  %s2147_s3 = inlined_call_operand.hbm [shape: f32[40,128], index: 3, kind: output, shape index: {}]  }
   0x1   :  { %10 = vsyncpa [#allocation3 + $0x1], 0  ;;  %s1756_s12 = smov 0   ;;  %s1758_s13 = smov 0  }
   0x2   :  { %s1760_s14 = smov 0   ;;  %s1762_s15 = smov 0  }
   0x3 LB: > { %s1777_s16 = sadd.s32 4294967295, %s1731_s15   ;;  %s1146_s17 = sadd.s32 4294967294, %s1731_s15   ;;  %s1731_s15 = sphi %s1762_s15, %s2153_s15   ;;  %s1727_s14 = sphi %s1760_s14, %s2152_s14   ;;  %s1723_s13 = sphi %s1758_s13, %s2151_s13   ;;  %s1719_s12 = sphi %s1756_s12, %s2150_s12  }
   0x4   : > { %s1781_s18 = sadd.s32 1, %s1731_s15   ;;  %s91_s19 = sadd.s32 1, %s1727_s14 }
   0x5   : > { %s88_s20 = ssub.s32 %s1731_s15, %s1781_s18  ;;  %p101_p0 = scmp.ne.s32.totalorder %s1727_s14, %s1723_s13 }
   0x6   : > { %p89_p1 = scmp.eq.s32.totalorder %s88_s20, 0  ;;  %p102_p2 = scmp.eq.s32.totalorder %s1777_s16, 4 }
   0x7   : > { %p107_p3 = scmp.ne.s32.totalorder %s1723_s13, %s1719_s12  ;;  %p108_p4 = scmp.eq.s32.totalorder %s1146_s17, 4 }
   0x8   : > { %s1792_s21 = scalar_select %p89_p1, %s1727_s14, %s91_s19  }
   0x9   : > { %p1794_p5 = por %p102_p2, %p101_p0  ;;  %p1798_p6 = por %p108_p4, %p107_p3 }
   0xa   : > { %p1149_p7 = scmp.ge.s32.totalorder %s1731_s15, 1  ;;  %p139_p8 = scmp.lt.s32.totalorder %s1731_s15, 6 }
   0xc   : > { %p140_p9 = pnand %p1149_p7, %p139_p8 }
   0xd   : > { %p162_p10 = scmp.lt.s32.totalorder (!%p140_p9), %s1777_s16, 4  ;;  %s159_s6 = sand.u32 (!%p140_p9), 1, %s1723_s13  }
   0xe   : > { %143 = sbr.rel (%p140_p9) target bundleno = 1805 (0x70d), region = 32  ;;  %s1150_s7 = sshll.u32 (!%p140_p9), %s159_s6, 3 }
   0xf   : > { %s1329_s8 = sshll.u32 (!%p140_p9), %s1777_s16, 7  ;;  %s161_s9 = scalar_lea.vmem (!%p140_p9), [#allocation2], %s1150_s7 }
  0x10   : > { %s1087_s10 = sshll.u32 (!%p140_p9), %s161_s9, 4  ;;  %s2109_s19 = scalar_lea.hbm (!%p140_p9), %s2147_s3, %s1329_s8  ;;  %s1088_s10 = int_to_ptr.vmem [resolvable:$true] %s1087_s10 }
  0x11   : > { %s1074_s20 = scalar_lea.sflag (!%p140_p9), [#allocation3], %s159_s6  ;;  %s1671_s24 = scalar_lea.vmem (!%p140_p9), %s1088_s10, 128 }
  0x12   : > { %p1672_p11 = scmp.ne.s32.totalorder (!%p140_p9), %s1088_s10, %s1671_s24 }
  0x13   : > { %v1733_v0 = vmov 0.0   ;;  %v1605_v1 = vld [vmem:[%s2145_s1 + $0x38] sm:$0xff]   ;;  %s163_s26 = scalar_select %p162_p10, %s1777_s16, 4  ;;  %v1606_v2 = vld [vmem:[%s2145_s1 + $0x30] sm:$0xff]   ;;  %v1607_v5 = vld [vmem:[%s2145_s1 + $0x28] sm:$0xff]   ;;  %vm1734_vm0 = vmmov 0   ;;  %v194_v31 = vlaneseq }
  0x14   : > { %1404 = vmatprep.subr.bf16.mxu0 %v1733_v0  ;;  %1424 = vmatprep.subr.bf16.mxu1 %v1733_v0  ;;  %v1608_v6 = vld [vmem:[%s2145_s1 + $0x20] sm:$0xff]   ;;  %v1609_v7 = vld [vmem:[%s2145_s1 + $0x18] sm:$0xff]   ;;  %v1610_v8 = vld [vmem:[%s2145_s1 + $0x10] sm:$0xff]   ;;  %p1673_p12 = pnand %p1672_p11, %p1794_p5  ;;  %s1735_s16 = smov [#allocation2]  }
  0x15   : > { %1405 = vmatpush3.bf16.msra.mxu0 %v1605_v1  ;;  %s1151_s29 = sshll.u32 %s163_s26, 3  ;;  %1420 = vmatprep.mubr.msk.bf16.mxu0 %vm1734_vm0, %v1733_v0  ;;  %v1611_v9 = vld [vmem:[%s2145_s1 + $0x8] sm:$0xff]   ;;  %v1612_v10 = vld [vmem:[%s2145_s1] sm:$0xff]   ;;  %v1613_v11 = vld [vmem:[%s2145_s1 + $0x78] sm:$0xff]   ;;  %v1905_v32 = vshrl.u32 %v194_v31, 7  ;;  %s1675_s25 = sshll.u32 %s1735_s16, 4  ;;  %s1676_s25 = int_to_ptr.vmem [resolvable:$false] %s1675_s25 }
  0x16   : > { %1406 = vmatprep.subr.bf16.mxu0 %v1733_v0  ;;  %s165_s5 = scalar_lea.vmem %s2144_s0, %s1151_s29  ;;  %1440 = vmatprep.mubr.msk.bf16.mxu1 %vm1734_vm0, %v1733_v0  ;;  %v1614_v12 = vld [vmem:[%s2145_s1 + $0x70] sm:$0xff]   ;;  %v1615_v13 = vld [vmem:[%s2145_s1 + $0x68] sm:$0xff]   ;;  %v1616_v14 = vld [vmem:[%s2145_s1 + $0x60] sm:$0xff]   ;;  %p1674_p13 = pneg %p1673_p12 }
  0x17   : > { %v167_v3 = vld [vmem:[%s165_s5] sm:$0xff]  ;;  %1425 = vmatpush3.bf16.msra.mxu1 %v1613_v11  ;;  %v1617_v15 = vld [vmem:[%s2145_s1 + $0x58] sm:$0xff]   ;;  %v1618_v16 = vld [vmem:[%s2145_s1 + $0x50] sm:$0xff]   ;;  %v196_v33 = vsub.s32 0, %v1905_v32  ;;  %v308_v52 = vsub.s32 1, %v1905_v32  ;;  %s1677_s26 = scalar_lea.vmem %s1676_s25, 256  ;;  %p1678_p0 = scmp.lt.s32.totalorder %s1088_s10, %s1676_s25 }
  0x18   : > { %v168_v4 = vmul.f32 %v167_v3, %v167_v3  ;;  %1426 = vmatprep.subr.bf16.mxu1 %v1733_v0  ;;  %v1619_v23 = vld [vmem:[%s2145_s1 + $0x48] sm:$0xff]   ;;  %v1620_v24 = vld [vmem:[%s2145_s1 + $0x40] sm:$0xff]   ;;  %v1621_v25 = vld [vmem:[%s2145_s1 + $0xb8] sm:$0xff]   ;;  %p1679_p1 = scmp.lt.s32.totalorder %s1677_s26, %s1671_s24 }
  0x19   : > { %1407 = vmatpush3.bf16.msra.mxu0 %v1606_v2  ;;  %v1622_v26 = vld [vmem:[%s2145_s1 + $0xb0] sm:$0xff]   ;;  %v1623_v27 = vld [vmem:[%s2145_s1 + $0xa8] sm:$0xff]   ;;  %v1624_v28 = vld [vmem:[%s2145_s1 + $0xa0] sm:$0xff]  }
  0x1a   : > { %1408 = vmatprep.subr.bf16.mxu0 %v1733_v0  ;;  %169 = vadd.xlane.f32.xlu0 %v168_v4  ;;  %v1625_v29 = vld [vmem:[%s2145_s1 + $0x98] sm:$0xff]   ;;  %v1626_v30 = vld [vmem:[%s2145_s1 + $0x90] sm:$0xff]   ;;  %v1911_v34 = vld [vmem:[%s2146_s2] sm:$0xff]  ;;  %p1680_p2 = por %p1679_p1, %p1678_p0 }
  0x1b   : > { %1427 = vmatpush3.bf16.msra.mxu1 %v1614_v12  ;;  %v197_v35 = vrot.slane %v1911_v34, %v196_v33  ;;  %v1627_v44 = vld [vmem:[%s2145_s1 + $0x88] sm:$0xff]   ;;  %v1628_v45 = vld [vmem:[%s2145_s1 + $0x80] sm:$0xff]   ;;  %v1629_v46 = vld [vmem:[%s2145_s1 + $0xf8] sm:$0xff]   ;;  %v309_v53 = vrot.slane %v1911_v34, %v308_v52 }
  0x1c   : > { %1428 = vmatprep.subr.bf16.mxu1 %v1733_v0  ;;  %v1630_v47 = vld [vmem:[%s2145_s1 + $0xf0] sm:$0xff]   ;;  %v1631_v48 = vld [vmem:[%s2145_s1 + $0xe8] sm:$0xff]   ;;  %v1632_v49 = vld [vmem:[%s2145_s1 + $0xe0] sm:$0xff]   ;;  %p1681_p3 = pnand %p1680_p2, %p1674_p13 }
  0x1d   : > { %1409 = vmatpush3.bf16.msra.mxu0 %v1607_v5  ;;  %v1633_v50 = vld [vmem:[%s2145_s1 + $0xd8] sm:$0xff]   ;;  %v1634_v51 = vld [vmem:[%s2145_s1 + $0xd0] sm:$0xff]   ;;  %v1635_v62 = vld [vmem:[%s2145_s1 + $0xc8] sm:$0xff]  }
  0x1e   : > { %1410 = vmatprep.subr.bf16.mxu0 %v1733_v0  ;;  %v1636_v63 = vld [vmem:[%s2145_s1 + $0xc0] sm:$0xff]   ;;  %v1637_v1 = vld [vmem:[%s2145_s1 + $0x138] sm:$0xff]   ;;  %v1638_v2 = vld [vmem:[%s2145_s1 + $0x130] sm:$0xff]  }
  0x1f   : > { %1429 = vmatpush3.bf16.msra.mxu1 %v1615_v13  ;;  %v1640_v4 = vld [vmem:[%s2145_s1 + $0x120] sm:$0xff]   ;;  %v1641_v5 = vld [vmem:[%s2145_s1 + $0x118] sm:$0xff]  }
  0x20   : > { %1430 = vmatprep.subr.bf16.mxu1 %v1733_v0 }
  0x21   : > { %1411 = vmatpush3.bf16.msra.mxu0 %v1608_v6  ;;  %v1642_v6 = vld [vmem:[%s2145_s1 + $0x110] sm:$0xff]  }
  0x22   : > { %1412 = vmatprep.subr.bf16.mxu0 %v1733_v0 }
  0x23   : > { %1431 = vmatpush3.bf16.msra.mxu1 %v1616_v14 }
  0x24   : > { %1432 = vmatprep.subr.bf16.mxu1 %v1733_v0 }
  0x25   : > { %1413 = vmatpush3.bf16.msra.mxu0 %v1609_v7  ;;  %v420_v7 = vsub.s32 2, %v1905_v32 }
  0x26   : > { %1414 = vmatprep.subr.bf16.mxu0 %v1733_v0 }
  0x27   : > { %1433 = vmatpush3.bf16.msra.mxu1 %v1617_v15 }
  0x28   : > { %1434 = vmatprep.subr.bf16.mxu1 %v1733_v0 }
  0x29   : > { %1415 = vmatpush3.bf16.msra.mxu0 %v1610_v8  ;;  %v421_v8 = vrot.slane %v1911_v34, %v420_v7 }
  0x2a   : > { %1416 = vmatprep.subr.bf16.mxu0 %v1733_v0 }
  0x2b   : > { %1435 = vmatpush3.bf16.msra.mxu1 %v1618_v16 }
  0x2c   : > { %1436 = vmatprep.subr.bf16.mxu1 %v1733_v0 }
  0x2d   : > { %1417 = vmatpush3.bf16.msra.mxu0 %v1611_v9 }
  0x2e   : > { %1418 = vmatprep.subr.bf16.mxu0 %v1733_v0 }
  0x2f   : > { %1437 = vmatpush3.bf16.msra.mxu1 %v1619_v23  ;;  %v1649_v23 = vld [vmem:[%s2145_s1 + $0x158] sm:$0xff]  }
  0x30   : > { %1438 = vmatprep.subr.bf16.mxu1 %v1733_v0 }
  0x31   : > { %1419 = vmatpush3.bf16.msra.mxu0 %v1612_v10 }
  0x32   : > { %1444 = vmatprep.subr.bf16.mxu0 %v1733_v0 }
  0x33   : > { %1439 = vmatpush3.bf16.msra.mxu1 %v1620_v24  ;;  %v1650_v24 = vld [vmem:[%s2145_s1 + $0x150] sm:$0xff]  }
  0x34   : > { %1464 = vmatprep.subr.bf16.mxu1 %v1733_v0 }
  0xa3   : > { %v170_v17 = vpop.xlane.xlu0 %169 }
  0xa4   : > { %v172_v18 = vmul.f32 0.0078125, %v170_v17  ;;  %v1643_v17 = vld [vmem:[%s2145_s1 + $0x108] sm:$0xff]  }
  0xa6   : > { %v173_v19 = vadd.f32 1e-08, %v172_v18  ;;  %v1644_v18 = vld [vmem:[%s2145_s1 + $0x100] sm:$0xff]  }
  0xa8   : > { %1669 = vrsqrt.f32 %v173_v19  ;;  %v1645_v19 = vld [vmem:[%s2145_s1 + $0x178] sm:$0xff]  }
  0xb5   : > { %v1670_v20 = vpop.eup %1669 }
  0xb6   : > { %v175_v21 = vmul.f32 %v1670_v20, %v167_v3  ;;  %v1639_v3 = vld [vmem:[%s2145_s1 + $0x128] sm:$0xff]   ;;  %v1646_v20 = vld [vmem:[%s2145_s1 + $0x170] sm:$0xff]  }
  0xb8   : > { %v177_v22 = vpack.c.bf16 %v175_v21, %v175_v21  ;;  %v1647_v21 = vld [vmem:[%s2145_s1 + $0x168] sm:$0xff]  }
  0xba   : > { %1421 = vmatmul.mubr.bf16.vlgmr.msra.gmra.mxu0 %v177_v22  ;;  %v1648_v22 = vld [vmem:[%s2145_s1 + $0x160] sm:$0xff]  }
  0xbb   : > { %1460 = vmatprep.mubr.msk.bf16.mxu0 %vm1734_vm0, %v1733_v0  ;;  %1445 = vmatpush3.bf16.msra.mxu0 %v1621_v25  ;;  %v532_v25 = vsub.s32 3, %v1905_v32 }
  0xbc   : > { %1446 = vmatprep.subr.bf16.mxu0 %v1733_v0 }
  0xbf   : > { %1447 = vmatpush3.bf16.msra.mxu0 %v1622_v26  ;;  %v533_v26 = vrot.slane %v1911_v34, %v532_v25 }
  0xc0   : > { %1448 = vmatprep.subr.bf16.mxu0 %v1733_v0 }
  0xc3   : > { %1449 = vmatpush3.bf16.msra.mxu0 %v1623_v27 }
  0xc4   : > { %1450 = vmatprep.subr.bf16.mxu0 %v1733_v0 }
  0xc7   : > { %1451 = vmatpush3.bf16.msra.mxu0 %v1624_v28 }
  0xc8   : > { %1452 = vmatprep.subr.bf16.mxu0 %v1733_v0 }
  0xcb   : > { %1453 = vmatpush3.bf16.msra.mxu0 %v1625_v29 }
  0xcc   : > { %1454 = vmatprep.subr.bf16.mxu0 %v1733_v0 }
  0xcf   : > { %1455 = vmatpush3.bf16.msra.mxu0 %v1626_v30 }
  0xd0   : > { %1456 = vmatprep.subr.bf16.mxu0 %v1733_v0 }
  0xd3   : > { %1457 = vmatpush3.bf16.msra.mxu0 %v1627_v44  ;;  %v1658_v44 = vld [vmem:[%s2145_s1 + $0x190] sm:$0xff]  }
  0xd4   : > { %1458 = vmatprep.subr.bf16.mxu0 %v1733_v0 }
  0xd7   : > { %1459 = vmatpush3.bf16.msra.mxu0 %v1628_v45  ;;  %v644_v45 = vsub.s32 4, %v1905_v32 }
  0xd8   : > { %1484 = vmatprep.subr.bf16.mxu0 %v1733_v0 }
 0x17a   : > { %v280_v36 = vpop.f32.mrf.mxu0 }
 0x17b   : > { %v281_v37 = vadd.f32 %v280_v36, %v197_v35 }
 0x17c   : > { %v1422_v38 = vpop.f32.mrf.mxu0 }
 0x17d   : > { %v286_v39 = vmul.f32 0.2, %v281_v37  ;;  %v1652_v38 = vld [vmem:[%s2145_s1 + $0x140] sm:$0xff]  }
 0x17e   : > { %v283_v40 = vpop.f32.mrf.mxu0 }
 0x17f   : > { %v287_v41 = vmax.f32 %v281_v37, %v286_v39  ;;  %v1651_v37 = vld [vmem:[%s2145_s1 + $0x148] sm:$0xff]   ;;  %v1653_v39 = vld [vmem:[%s2145_s1 + $0x1b8] sm:$0xff]   ;;  %v1654_v40 = vld [vmem:[%s2145_s1 + $0x1b0] sm:$0xff]  }
 0x180   : > { %v1423_v42 = vpop.f32.mrf.mxu0 }
 0x181   : > { %v288_v43 = vpack.c.bf16 %v287_v41, %v287_v41  ;;  %v1655_v41 = vld [vmem:[%s2145_s1 + $0x1a8] sm:$0xff]   ;;  %v1656_v42 = vld [vmem:[%s2145_s1 + $0x1a0] sm:$0xff]  }
 0x183   : > { %1441 = vmatmul.mubr.bf16.vlgmr.msra.gmra.mxu1 %v288_v43  ;;  %v1657_v43 = vld [vmem:[%s2145_s1 + $0x198] sm:$0xff]  }
 0x184   : > { %1480 = vmatprep.mubr.msk.bf16.mxu1 %vm1734_vm0, %v1733_v0  ;;  %1465 = vmatpush3.bf16.msra.mxu1 %v1629_v46  ;;  %v645_v46 = vrot.slane %v1911_v34, %v644_v45 }
 0x185   : > { %1466 = vmatprep.subr.bf16.mxu1 %v1733_v0 }
 0x188   : > { %1467 = vmatpush3.bf16.msra.mxu1 %v1630_v47 }
 0x189   : > { %1468 = vmatprep.subr.bf16.mxu1 %v1733_v0 }
 0x18c   : > { %1469 = vmatpush3.bf16.msra.mxu1 %v1631_v48 }
 0x18d   : > { %1470 = vmatprep.subr.bf16.mxu1 %v1733_v0 }
 0x190   : > { %1471 = vmatpush3.bf16.msra.mxu1 %v1632_v49 }
 0x191   : > { %1472 = vmatprep.subr.bf16.mxu1 %v1733_v0 }
 0x194   : > { %1473 = vmatpush3.bf16.msra.mxu1 %v1633_v50 }
 0x195   : > { %1474 = vmatprep.subr.bf16.mxu1 %v1733_v0 }
 0x198   : > { %1475 = vmatpush3.bf16.msra.mxu1 %v1634_v51 }
 0x199   : > { %1476 = vmatprep.subr.bf16.mxu1 %v1733_v0 }
 0x19c   : > { %1477 = vmatpush3.bf16.msra.mxu1 %v1635_v62  ;;  %v1666_v62 = vld [vmem:[%s2145_s1 + $0x1d0] sm:$0xff]  }
 0x19d   : > { %1478 = vmatprep.subr.bf16.mxu1 %v1733_v0 }
 0x1a0   : > { %1479 = vmatpush3.bf16.msra.mxu1 %v1636_v63  ;;  %v756_v63 = vsub.s32 5, %v1905_v32 }
 0x1a1   : > { %1504 = vmatprep.subr.bf16.mxu1 %v1733_v0 }
 0x243   : > { %v392_v54 = vpop.f32.mrf.mxu1 }
 0x244   : > { %v393_v55 = vadd.f32 %v392_v54, %v309_v53 }
 0x245   : > { %v1442_v56 = vpop.f32.mrf.mxu1 }
 0x246   : > { %v398_v57 = vmul.f32 0.2, %v393_v55  ;;  %v1660_v56 = vld [vmem:[%s2145_s1 + $0x180] sm:$0xff]  }
 0x247   : > { %v395_v58 = vpop.f32.mrf.mxu1 }
 0x248   : > { %v399_v59 = vmax.f32 %v393_v55, %v398_v57  ;;  %v1659_v55 = vld [vmem:[%s2145_s1 + $0x188] sm:$0xff]   ;;  %v1661_v57 = vld [vmem:[%s2145_s1 + $0x1f8] sm:$0xff]   ;;  %v1662_v58 = vld [vmem:[%s2145_s1 + $0x1f0] sm:$0xff]  }
 0x249   : > { %v1443_v60 = vpop.f32.mrf.mxu1 }
 0x24a   : > { %v400_v61 = vpack.c.bf16 %v399_v59, %v399_v59  ;;  %v1663_v59 = vld [vmem:[%s2145_s1 + $0x1e8] sm:$0xff]   ;;  %v1664_v60 = vld [vmem:[%s2145_s1 + $0x1e0] sm:$0xff]  }
 0x24c   : > { %1461 = vmatmul.mubr.bf16.vlgmr.msra.gmra.mxu0 %v400_v61  ;;  %v1665_v61 = vld [vmem:[%s2145_s1 + $0x1d8] sm:$0xff]  }
 0x24d   : > { %1500 = vmatprep.mubr.msk.bf16.mxu0 %vm1734_vm0, %v1733_v0  ;;  %1485 = vmatpush3.bf16.msra.mxu0 %v1637_v1  ;;  %v757_v1 = vrot.slane %v1911_v34, %v756_v63 }
 0x24e   : > { %1486 = vmatprep.subr.bf16.mxu0 %v1733_v0 }
 0x251   : > { %1487 = vmatpush3.bf16.msra.mxu0 %v1638_v2 }
 0x252   : > { %1488 = vmatprep.subr.bf16.mxu0 %v1733_v0 }
 0x255   : > { %1489 = vmatpush3.bf16.msra.mxu0 %v1639_v3 }
 0x256   : > { %1490 = vmatprep.subr.bf16.mxu0 %v1733_v0 }
 0x259   : > { %1491 = vmatpush3.bf16.msra.mxu0 %v1640_v4 }
 0x25a   : > { %1492 = vmatprep.subr.bf16.mxu0 %v1733_v0 }
 0x25d   : > { %1493 = vmatpush3.bf16.msra.mxu0 %v1641_v5 }
 0x25e   : > { %1494 = vmatprep.subr.bf16.mxu0 %v1733_v0 }
 0x261   : > { %1495 = vmatpush3.bf16.msra.mxu0 %v1642_v6 }
 0x262   : > { %1496 = vmatprep.subr.bf16.mxu0 %v1733_v0 }
 0x265   : > { %1497 = vmatpush3.bf16.msra.mxu0 %v1643_v17 }
 0x266   : > { %1498 = vmatprep.subr.bf16.mxu0 %v1733_v0 }
 0x269   : > { %1499 = vmatpush3.bf16.msra.mxu0 %v1644_v18 }
 0x26a   : > { %1524 = vmatprep.subr.bf16.mxu0 %v1733_v0 }
 0x30c   : > { %v504_v9 = vpop.f32.mrf.mxu0 }
 0x30d   : > { %v505_v10 = vadd.f32 %v504_v9, %v421_v8 }
 0x30e   : > { %v1462_v11 = vpop.f32.mrf.mxu0 }
 0x30f   : > { %v510_v12 = vmul.f32 0.2, %v505_v10  ;;  %v1668_v11 = vld [vmem:[%s2145_s1 + $0x1c0] sm:$0xff]  }
 0x310   : > { %v507_v13 = vpop.f32.mrf.mxu0 }
 0x311   : > { %v511_v14 = vmax.f32 %v505_v10, %v510_v12  ;;  %v1667_v10 = vld [vmem:[%s2145_s1 + $0x1c8] sm:$0xff]   ;;  %v868_v12 = vsub.s32 6, %v1905_v32 }
 0x312   : > { %v1463_v15 = vpop.f32.mrf.mxu0 }
 0x313   : > { %v512_v16 = vpack.c.bf16 %v511_v14, %v511_v14  ;;  %v869_v13 = vrot.slane %v1911_v34, %v868_v12 }
 0x315   : > { %1481 = vmatmul.mubr.bf16.vlgmr.msra.gmra.mxu1 %v512_v16 }
 0x316   : > { %1520 = vmatprep.mubr.msk.bf16.mxu1 %vm1734_vm0, %v1733_v0  ;;  %1505 = vmatpush3.bf16.msra.mxu1 %v1645_v19 }
 0x317   : > { %1506 = vmatprep.subr.bf16.mxu1 %v1733_v0 }
 0x31a   : > { %1507 = vmatpush3.bf16.msra.mxu1 %v1646_v20 }
 0x31b   : > { %1508 = vmatprep.subr.bf16.mxu1 %v1733_v0 }
 0x31e   : > { %1509 = vmatpush3.bf16.msra.mxu1 %v1647_v21 }
 0x31f   : > { %1510 = vmatprep.subr.bf16.mxu1 %v1733_v0 }
 0x322   : > { %1511 = vmatpush3.bf16.msra.mxu1 %v1648_v22 }
 0x323   : > { %1512 = vmatprep.subr.bf16.mxu1 %v1733_v0 }
 0x326   : > { %1513 = vmatpush3.bf16.msra.mxu1 %v1649_v23 }
 0x327   : > { %1514 = vmatprep.subr.bf16.mxu1 %v1733_v0 }
 0x32a   : > { %1515 = vmatpush3.bf16.msra.mxu1 %v1650_v24 }
 0x32b   : > { %1516 = vmatprep.subr.bf16.mxu1 %v1733_v0 }
 0x32e   : > { %1517 = vmatpush3.bf16.msra.mxu1 %v1651_v37 }
 0x32f   : > { %1518 = vmatprep.subr.bf16.mxu1 %v1733_v0 }
 0x332   : > { %1519 = vmatpush3.bf16.msra.mxu1 %v1652_v38 }
 0x333   : > { %1544 = vmatprep.subr.bf16.mxu1 %v1733_v0 }
 0x3d5   : > { %v616_v27 = vpop.f32.mrf.mxu1 }
 0x3d6   : > { %v617_v28 = vadd.f32 %v616_v27, %v533_v26 }
 0x3d7   : > { %v1482_v29 = vpop.f32.mrf.mxu1 }
 0x3d8   : > { %v622_v30 = vmul.f32 0.2, %v617_v28 }
 0x3d9   : > { %v619_v31 = vpop.f32.mrf.mxu1 }
 0x3da   : > { %v623_v33 = vmax.f32 %v617_v28, %v622_v30 }
 0x3db   : > { %v1483_v35 = vpop.f32.mrf.mxu1 }
 0x3dc   : > { %v624_v36 = vpack.c.bf16 %v623_v33, %v623_v33 }
 0x3de   : > { %1501 = vmatmul.mubr.bf16.vlgmr.msra.gmra.mxu0 %v624_v36 }
 0x3df   : > { %1540 = vmatprep.mubr.msk.bf16.mxu0 %vm1734_vm0, %v1733_v0  ;;  %1525 = vmatpush3.bf16.msra.mxu0 %v1653_v39 }
 0x3e0   : > { %1526 = vmatprep.subr.bf16.mxu0 %v1733_v0 }
 0x3e3   : > { %1527 = vmatpush3.bf16.msra.mxu0 %v1654_v40 }
 0x3e4   : > { %1528 = vmatprep.subr.bf16.mxu0 %v1733_v0 }
 0x3e7   : > { %1529 = vmatpush3.bf16.msra.mxu0 %v1655_v41 }
 0x3e8   : > { %1530 = vmatprep.subr.bf16.mxu0 %v1733_v0 }
 0x3eb   : > { %1531 = vmatpush3.bf16.msra.mxu0 %v1656_v42 }
 0x3ec   : > { %1532 = vmatprep.subr.bf16.mxu0 %v1733_v0 }
 0x3ef   : > { %1533 = vmatpush3.bf16.msra.mxu0 %v1657_v43 }
 0x3f0   : > { %1534 = vmatprep.subr.bf16.mxu0 %v1733_v0 }
 0x3f3   : > { %1535 = vmatpush3.bf16.msra.mxu0 %v1658_v44 }
 0x3f4   : > { %1536 = vmatprep.subr.bf16.mxu0 %v1733_v0 }
 0x3f7   : > { %1537 = vmatpush3.bf16.msra.mxu0 %v1659_v55 }
 0x3f8   : > { %1538 = vmatprep.subr.bf16.mxu0 %v1733_v0 }
 0x3fb   : > { %1539 = vmatpush3.bf16.msra.mxu0 %v1660_v56 }
 0x49e   : > { %v728_v47 = vpop.f32.mrf.mxu0 }
 0x49f   : > { %v729_v48 = vadd.f32 %v728_v47, %v645_v46 }
 0x4a0   : > { %v1502_v49 = vpop.f32.mrf.mxu0 }
 0x4a1   : > { %v734_v50 = vmul.f32 0.2, %v729_v48 }
 0x4a2   : > { %v731_v51 = vpop.f32.mrf.mxu0 }
 0x4a3   : > { %v735_v52 = vmax.f32 %v729_v48, %v734_v50 }
 0x4a4   : > { %v1503_v53 = vpop.f32.mrf.mxu0 }
 0x4a5   : > { %v736_v54 = vpack.c.bf16 %v735_v52, %v735_v52 }
 0x4a7   : > { %1521 = vmatmul.mubr.bf16.vlgmr.msra.gmra.mxu1 %v736_v54 }
 0x4a8   : > { %1560 = vmatprep.mubr.msk.bf16.mxu1 %vm1734_vm0, %v1733_v0  ;;  %1545 = vmatpush3.bf16.msra.mxu1 %v1661_v57 }
 0x4a9   : > { %1546 = vmatprep.subr.bf16.mxu1 %v1733_v0 }
 0x4ac   : > { %1547 = vmatpush3.bf16.msra.mxu1 %v1662_v58 }
 0x4ad   : > { %1548 = vmatprep.subr.bf16.mxu1 %v1733_v0 }
 0x4b0   : > { %1549 = vmatpush3.bf16.msra.mxu1 %v1663_v59 }
 0x4b1   : > { %1550 = vmatprep.subr.bf16.mxu1 %v1733_v0 }
 0x4b4   : > { %1551 = vmatpush3.bf16.msra.mxu1 %v1664_v60 }
 0x4b5   : > { %1552 = vmatprep.subr.bf16.mxu1 %v1733_v0 }
 0x4b8   : > { %1553 = vmatpush3.bf16.msra.mxu1 %v1665_v61 }
 0x4b9   : > { %1554 = vmatprep.subr.bf16.mxu1 %v1733_v0 }
 0x4bc   : > { %1555 = vmatpush3.bf16.msra.mxu1 %v1666_v62 }
 0x4bd   : > { %1556 = vmatprep.subr.bf16.mxu1 %v1733_v0 }
 0x4c0   : > { %1557 = vmatpush3.bf16.msra.mxu1 %v1667_v10 }
 0x4c1   : > { %1558 = vmatprep.subr.bf16.mxu1 %v1733_v0  ;;  %v980_v0 = vsub.s32 7, %v1905_v32 }
 0x4c3   : > { %v981_v22 = vrot.slane %v1911_v34, %v980_v0 }
 0x4c4   : > { %1559 = vmatpush3.bf16.msra.mxu1 %v1668_v11 }
 0x567   : > { %v840_v2 = vpop.f32.mrf.mxu1 }
 0x568   : > { %v841_v3 = vadd.f32 %v840_v2, %v757_v1 }
 0x569   : > { %v1522_v4 = vpop.f32.mrf.mxu1 }
 0x56a   : > { %v846_v5 = vmul.f32 0.2, %v841_v3 }
 0x56b   : > { %v843_v6 = vpop.f32.mrf.mxu1 }
 0x56c   : > { %v847_v7 = vmax.f32 %v841_v3, %v846_v5 }
 0x56d   : > { %v1523_v8 = vpop.f32.mrf.mxu1 }
 0x56e   : > { %v848_v9 = vpack.c.bf16 %v847_v7, %v847_v7 }
 0x570   : > { %1541 = vmatmul.mubr.bf16.vlgmr.msra.gmra.mxu0 %v848_v9 }
 0x630   : > { %v952_v14 = vpop.f32.mrf.mxu0 }
 0x631   : > { %v953_v15 = vadd.f32 %v952_v14, %v869_v13 }
 0x632   : > { %v1542_v16 = vpop.f32.mrf.mxu0 }
 0x633   : > { %v958_v17 = vmul.f32 0.2, %v953_v15 }
 0x634   : > { %v955_v18 = vpop.f32.mrf.mxu0 }
 0x635   : > { %v959_v19 = vmax.f32 %v953_v15, %v958_v17 }
 0x636   : > { %v1543_v20 = vpop.f32.mrf.mxu0 }
 0x637   : > { %v960_v21 = vpack.c.bf16 %v959_v19, %v959_v19 }
 0x639   : > { %1561 = vmatmul.mubr.bf16.vlgmr.msra.gmra.mxu1 %v960_v21 }
 0x6f9   : > { %v1064_v23 = vpop.f32.mrf.mxu1 }
 0x6fa   : > { %v1065_v24 = vadd.f32 %v1064_v23, %v981_v22 }
 0x6fb   : > { %v1562_v25 = vpop.f32.mrf.mxu1 }
 0x6fc   : > { %v1070_v26 = vmul.f32 0.2, %v1065_v24 }
 0x6fd   : > { %v1067_v27 = vpop.f32.mrf.mxu1 }
 0x6fe   : > { %v1071_v28 = vmax.f32 %v1065_v24, %v1070_v26 }
 0x6ff   : > { %v1563_v32 = vpop.f32.mrf.mxu1 }
 0x700   : > { %1072 = vst [vmem:[%s161_s9] sm:$0xff] %v1071_v28 }
 0x701   : > { %1684 = shalt.err (!%p1681_p3)
}
 0x702   : > { %s1685_s27 = scalar_lea.hbm %s2109_s19, 128  ;;  %s1689_s30 = scalar_lea.hbm %s2147_s3, 640 }
 0x703   : > { %p1686_p4 = scmp.ne.s32.totalorder %s2109_s19, %s1685_s27  ;;  %p1690_p9 = scmp.lt.s32.totalorder %s2109_s19, %s2147_s3 }
 0x704   : > { %p1691_p10 = scmp.lt.s32.totalorder %s1689_s30, %s1685_s27 }
 0x705   : > { %p1687_p7 = pnand %p1686_p4, %p1794_p5 }
 0x706   : > { %p1692_p11 = por %p1691_p10, %p1690_p9 }
 0x707   : > { %p1688_p8 = pneg %p1687_p7 }
 0x709   : > { %p1693_p12 = pnand %p1692_p11, %p1688_p8 }
 0x70b   : > { %1696 = shalt.err (!%p1693_p12)
}
 0x70c   : > { %1564 = dma.vmem_to_hbm [thread:$0]  (%p1794_p5), %s1088_s10, 128, %s2109_s19, %s1074_s20  }
 0x70d PF: > { %p1570_p13 = scmp.ge.s32.totalorder %s1731_s15, 2  ;;  %s1099_s6 = sand.u32 1, %s1719_s12  }
 0x70e   : > { %s1100_s7 = scalar_lea.sflag [#allocation3], %s1099_s6 }
 0x70f   : > { %p1567_p0 = pnand %p1570_p13, %p1798_p6 }
 0x711   : > { %p1568_p1 = pneg %p1567_p0 }
 0x713   : > { %1714 = dma.done.wait (%p1568_p1), %s1100_s7, 128  }
 0x714   : > { %1716 = vsyncadd (%p1568_p1), %s1100_s7, 4294967168  ;;  %p13_p2 = scmp.ge.s32.totalorder %s1781_s18, 7   ;;  %s2150_s12 = smov %s1723_s13 }
 0x715   : > { %s2151_s13 = smov %s1727_s14  ;;  %s2152_s14 = smov %s1792_s21 }
 0x716   : > { %s2153_s15 = smov %s1781_s18  ;;  %15 = sbr.rel (!%p13_p2) target bundleno = 3 (0x3), region = 74 }
 0x71b   :  { %1105 = vsyncpa [#allocation3], 1 }
 0x71c   :  { %1107 = vsyncpa [#allocation3 + $0x1], 1 }

</bundles_post_ra>
